<compile_context>
chip_gen: v7x
topology: tpu7x:2x2x1
jax: 0.10.0
libtpu: 0.0.40
codegen_flags: <defaults>
</compile_context>

<pallas_src>
import functools

import jax
import jax.numpy as jnp
from jax.experimental import pallas as pl
from jax.experimental.pallas import tpu as pltpu

_LANES = 128
# Budgets are expressed in f32-equivalent bytes (elements * 4) so that any
# in-kernel f32 cast temporaries stay bounded regardless of the input dtype.
_FLAT_IMG_BUDGET = 1 << 20    # use the flat (whole-image-per-block) path below this
_FLAT_STEP_TARGET = 2 << 20   # ~2 MiB of data per flat grid step (batch folding)
_TILE_STEP_TARGET = 6 << 20   # ~6 MiB of DMA per tiled grid step (v7x-friendly)


# ----------------------------------------------------------------------------
# Kernels
# ----------------------------------------------------------------------------
def _flat_kernel(x_ref, o_ref, *, inv_hw):
    """Whole image(s) per block.  x_ref: (Bt, C, hw), o_ref: (Bt, 1, 1)."""
    x = x_ref[...].astype(jnp.float32)
    m = jnp.sum(x, axis=-1, keepdims=True) * inv_hw          # (Bt, C, 1)
    s = jnp.sum(jnp.abs(m - 0.5), axis=1, keepdims=True)     # (Bt, 1, 1)
    o_ref[...] = (s * s).astype(o_ref.dtype)


def _dense_single_kernel(x_ref, o_ref, *, inv_hw):
    """One lane-dense block per image.  x_ref: (1, C, rows, 128), o_ref: (1,1,1)."""
    sums = jnp.sum(x_ref[...].astype(jnp.float32), axis=(2, 3))   # (1, C)
    s = jnp.sum(jnp.abs(sums * inv_hw - 0.5))                     # scalar
    o_ref[...] = jnp.reshape(s * s, (1, 1, 1)).astype(o_ref.dtype)


def _dense_tiled_kernel(x_ref, o_ref, acc_ref, *, inv_hw, sub, last_rows):
    """Tiled spatial reduction with a tiny resident accumulator.

    x_ref:   (1, C, s_tile, 128) tile of one image
    o_ref:   (1, 1, 1) per-image output (resident across the k axis)
    acc_ref: (C, sub, 128) f32 partial sums (a few vregs)
    """
    k = pl.program_id(1)
    nk = pl.num_programs(1)

    @pl.when(k == 0)
    def _init():
        acc_ref[...] = jnp.zeros_like(acc_ref)

    @pl.when(k < nk - 1)
    def _accumulate():
        c = x_ref.shape[1]
        s_tile = x_ref.shape[2]
        # Sublane-group partial reduction: only (C, sub, 128) worth of stores
        # per step; the reshape splits the sublane dim at native-tile
        # granularity (sub = 8/16/32 depending on dtype) and is free.
        xg = x_ref[...].reshape(c, s_tile // sub, sub, _LANES).astype(jnp.float32)
        acc_ref[...] += jnp.sum(xg, axis=1)

    @pl.when(k == nk - 1)
    def _finalize():
        # The last tile may be ragged in the row dimension; `last_rows` is a
        # static Python int, so this is a cheap static slice (no iota/select
        # over the whole tile and no padding copy in the wrapper).
        tail = jnp.sum(x_ref[0, :, :last_rows, :].astype(jnp.float32),
                       axis=(1, 2))                               # (C,)
        sums = jnp.sum(acc_ref[...], axis=(1, 2)) + tail          # (C,)
        s = jnp.sum(jnp.abs(sums * inv_hw - 0.5))
        o_ref[...] = jnp.reshape(s * s, (1, 1, 1)).astype(o_ref.dtype)


# ----------------------------------------------------------------------------
# pallas_call wrappers
# ----------------------------------------------------------------------------
def _flat_call(x3, *, inv_hw, img_f32_bytes, flat_step_budget):
    B, C, hw = x3.shape
    # Batch folding: target ~flat_step_budget of data per grid step.
    bt = int(max(1, min(B, flat_step_budget // max(1, img_f32_bytes))))
    grid = (pl.cdiv(B, bt),)
    return pl.pallas_call(
        functools.partial(_flat_kernel, inv_hw=inv_hw),
        out_shape=jax.ShapeDtypeStruct((B, 1, 1), x3.dtype),
        grid_spec=pltpu.PrefetchScalarGridSpec(
            num_scalar_prefetch=0,
            grid=grid,
            # Full-extent last two dims -> no (8,128) constraint, no padding.
            in_specs=[pl.BlockSpec((bt, C, hw), lambda i: (i, 0, 0))],
            out_specs=pl.BlockSpec((bt, 1, 1), lambda i: (i, 0, 0)),
        ),
        compiler_params=pltpu.CompilerParams(dimension_semantics=("parallel",)),
    )(x3)


def _dense_single_call(x4, *, inv_hw):
    B, C, rows, _ = x4.shape
    return pl.pallas_call(
        functools.partial(_dense_single_kernel, inv_hw=inv_hw),
        out_shape=jax.ShapeDtypeStruct((B, 1, 1), x4.dtype),
        grid_spec=pltpu.PrefetchScalarGridSpec(
            num_scalar_prefetch=0,
            grid=(B,),
            in_specs=[pl.BlockSpec((1, C, rows, _LANES), lambda b: (b, 0, 0, 0))],
            out_specs=pl.BlockSpec((1, 1, 1), lambda b: (b, 0, 0)),
        ),
        compiler_params=pltpu.CompilerParams(
            dimension_semantics=("parallel",),
            vmem_limit_bytes=32 * 1024 * 1024,
        ),
    )(x4)


def _dense_tiled_call(x4, *, inv_hw, s_tile, sub):
    B, C, rows, _ = x4.shape
    num_tiles = pl.cdiv(rows, s_tile)
    last_rows = rows - (num_tiles - 1) * s_tile
    kernel = functools.partial(
        _dense_tiled_kernel, inv_hw=inv_hw, sub=sub, last_rows=last_rows)
    # TODO(synk): on v7x with B == 1 (or B < num_cores) and very large images,
    # add a two-level reduction (leading parallel axis over cores, per-core
    # partial sums combined in a tiny finalize) so both TensorCores are used.
    # NOTE: pipeline_mode=pl.Buffered(3) on the input spec may hide DMA issue
    # latency on v7x; left at the default 2 buffers — enable only if measured.
    return pl.pallas_call(
        kernel,
        out_shape=jax.ShapeDtypeStruct((B, 1, 1), x4.dtype),
        grid_spec=pltpu.PrefetchScalarGridSpec(
            num_scalar_prefetch=0,
            grid=(B, num_tiles),
            in_specs=[pl.BlockSpec((1, C, s_tile, _LANES),
                                   lambda b, k: (b, 0, k, 0))],
            out_specs=pl.BlockSpec((1, 1, 1), lambda b, k: (b, 0, 0)),
            scratch_shapes=[pltpu.VMEM((C, sub, _LANES), jnp.float32)],
        ),
        compiler_params=pltpu.CompilerParams(
            dimension_semantics=("parallel", "arbitrary"),
            vmem_limit_bytes=32 * 1024 * 1024,
        ),
    )(x4)


# ----------------------------------------------------------------------------
# Public entry point
# ----------------------------------------------------------------------------
def color_loss_improved(x, *,
                        flat_img_budget=_FLAT_IMG_BUDGET,
                        flat_step_budget=_FLAT_STEP_TARGET,
                        tile_step_budget=_TILE_STEP_TARGET):
    """x: (B, C, H, W) float, C == 3 for RGB.  Returns (B, 1, 1, 1)."""
    B, C, H, W = x.shape
    hw = H * W
    inv_hw = 1.0 / float(hw)
    itemsize = jnp.dtype(x.dtype).itemsize
    sub = 8 * max(1, 4 // itemsize)          # sublane multiple: 8/16/32 by dtype
    img_f32_bytes = 4 * C * hw               # per-image footprint, f32-equivalent
    aligned = (hw % _LANES) == 0

    # Flat path: small images (batch-folded) and moderately sized unaligned
    # images — unpadded full-extent blocks, one grid step per image group.
    if img_f32_bytes <= flat_img_budget or (
            not aligned and img_f32_bytes <= 2 * flat_img_budget):
        out3 = _flat_call(x.reshape(B, C, hw), inv_hw=inv_hw,
                          img_f32_bytes=img_f32_bytes,
                          flat_step_budget=flat_step_budget)
        return out3.reshape(B, 1, 1, 1)

    # Dense (lane-dense 4D) paths for larger images.
    if aligned:
        rows = hw // _LANES
        x4 = x.reshape(B, C, rows, _LANES)           # free reshape
    else:
        # TODO(synk): mask the ragged spatial tail in-kernel instead of padding;
        # very large images with H*W % 128 != 0 currently pay one extra copy.
        pad = (-hw) % _LANES
        rows = (hw + pad) // _LANES
        x4 = jnp.pad(x.reshape(B, C, hw),
                     ((0, 0), (0, 0), (0, pad))).reshape(B, C, rows, _LANES)

    # Tile height targeting ~tile_step_budget per grid step, rounded to the
    # dtype's sublane multiple.
    s_tile_max = max(sub, (tile_step_budget // (4 * C * _LANES)) // sub * sub)
    if rows <= s_tile_max:
        out3 = _dense_single_call(x4, inv_hw=inv_hw)      # num_tiles == 1 case
    else:
        out3 = _dense_tiled_call(x4, inv_hw=inv_hw, s_tile=int(s_tile_max), sub=sub)
    return out3.reshape(B, 1, 1, 1)


def color_loss_ref(x):
    """Pure-JAX reference mirroring the PyTorch forward."""
    mean_rgb = jnp.mean(x, axis=(2, 3), keepdims=True)     # (B, C, 1, 1)
    mr = mean_rgb[:, 0:1]
    mg = mean_rgb[:, 1:2]
    mb = mean_rgb[:, 2:3]
    return jnp.power(jnp.abs(mr - 0.5) + jnp.abs(mg - 0.5) + jnp.abs(mb - 0.5), 2)


if __name__ == "__main__":
    key = jax.random.PRNGKey(0)

    # 1) Primary case: small RGB input -> flat batched path (batch folding).
    B, C, H, W = 2, 3, 16, 16
    x = jax.random.uniform(key, (B, C, H, W), dtype=jnp.float32)
    out = jax.block_until_ready(color_loss_improved(x))
    ref = color_loss_ref(x)
    assert out.shape == (B, 1, 1, 1), out.shape
    assert jnp.allclose(out, ref, atol=1e-6, rtol=1e-4), (out, ref)

    # 2) Unaligned spatial size (H*W % 128 != 0) -> flat path, no padding copy.
    x2 = jax.random.uniform(jax.random.PRNGKey(1), (2, 3, 7, 9), dtype=jnp.float32)
    out2 = jax.block_until_ready(color_loss_improved(x2))
    assert jnp.allclose(out2, color_loss_ref(x2), atol=1e-6, rtol=1e-4)

    # 3) Tiled path, evenly dividing tiles (forced via tiny budgets).
    x3 = jax.random.uniform(jax.random.PRNGKey(2), (2, 3, 64, 64), dtype=jnp.float32)
    out3 = jax.block_until_ready(color_loss_improved(
        x3, flat_img_budget=0, tile_step_budget=8 * 128 * 4 * 3))
    assert jnp.allclose(out3, color_loss_ref(x3), atol=1e-6, rtol=1e-4)

    # 4) Tiled path with a ragged last tile (rows = 33, s_tile = 8).
    x4 = jax.random.uniform(jax.random.PRNGKey(3), (2, 3, 66, 64), dtype=jnp.float32)
    out4 = jax.block_until_ready(color_loss_improved(
        x4, flat_img_budget=0, tile_step_budget=8 * 128 * 4 * 3))
    assert jnp.allclose(out4, color_loss_ref(x4), atol=1e-6, rtol=1e-4)

    # 5) Dense single-block path (num_tiles == 1 special case).
    x5 = jax.random.uniform(jax.random.PRNGKey(4), (2, 3, 32, 128), dtype=jnp.float32)
    out5 = jax.block_until_ready(color_loss_improved(x5, flat_img_budget=0))
    assert jnp.allclose(out5, color_loss_ref(x5), atol=1e-6, rtol=1e-4)

    # 6) bfloat16 input (flat path, f32 accumulation, loose tolerance).
    x6 = jax.random.uniform(jax.random.PRNGKey(5), (2, 3, 16, 16), dtype=jnp.bfloat16)
    out6 = jax.block_until_ready(color_loss_improved(x6))
    ref6 = color_loss_ref(x6.astype(jnp.float32))
    assert jnp.allclose(out6.astype(jnp.float32), ref6, atol=1e-3, rtol=0.05)

    print("KERNEL_OK")
</pallas_src>

<mosaic_0001>
module attributes {stable_mosaic.version = 11 : i64} {
  func.func @_flat_kernel(%arg0: i32, %arg1: memref<2x3x256xf32, #tpu.memory_space<vmem>>, %arg2: memref<2x1x1xf32, #tpu.memory_space<vmem>>) attributes {dimension_semantics = [#tpu.dimension_semantics<parallel>], iteration_bounds = array<i64: 1>, scalar_prefetch = 0 : i64, scratch_operands = 0 : i64, tpu.core_type = #tpu.core_type<tc>, window_params = [{transform_indices = @transform_0, window_bounds = array<i64: 2, 3, 256>}, {transform_indices = @transform_1, window_bounds = array<i64: 2, 1, 1>}]} {
    %c0 = arith.constant 0 : index
    %c0_0 = arith.constant 0 : index
    %c0_1 = arith.constant 0 : index
    %0 = vector.load %arg1[%c0, %c0_0, %c0_1] : memref<2x3x256xf32, #tpu.memory_space<vmem>>, vector<2x3x256xf32>
    %cst = arith.constant dense<0.000000e+00> : vector<2x3xf32>
    %1 = vector.multi_reduction <add>, %0, %cst [2] : vector<2x3x256xf32> to vector<2x3xf32>
    %2 = vector.shape_cast %1 : vector<2x3xf32> to vector<2x3x1xf32>
    %cst_2 = arith.constant 3.906250e-03 : f32
    %3 = vector.broadcast %cst_2 : f32 to vector<2x3x1xf32>
    %4 = arith.mulf %2, %3 : vector<2x3x1xf32>
    %cst_3 = arith.constant 5.000000e-01 : f32
    %5 = vector.broadcast %cst_3 : f32 to vector<2x3x1xf32>
    %6 = arith.subf %4, %5 : vector<2x3x1xf32>
    %7 = math.absf %6 : vector<2x3x1xf32>
    %cst_4 = arith.constant dense<0.000000e+00> : vector<2x1xf32>
    %8 = vector.multi_reduction <add>, %7, %cst_4 [1] : vector<2x3x1xf32> to vector<2x1xf32>
    %9 = vector.shape_cast %8 : vector<2x1xf32> to vector<2x1x1xf32>
    %10 = arith.mulf %9, %9 : vector<2x1x1xf32>
    %c0_5 = arith.constant 0 : index
    %c0_6 = arith.constant 0 : index
    %c0_7 = arith.constant 0 : index
    %11 = vector.load %arg2[%c0_5, %c0_6, %c0_7] : memref<2x1x1xf32, #tpu.memory_space<vmem>>, vector<2x1x1xf32>
    tpu.vector_store %arg2[%c0_5, %c0_6, %c0_7], %10 {strides = array<i32>} : memref<2x1x1xf32, #tpu.memory_space<vmem>>, vector<2x1x1xf32>,
    return
  }
  func.func @transform_0(%arg0: i32) -> (i32, i32, i32) {
    %c0_i32 = arith.constant 0 : i32
    %c0_i32_0 = arith.constant 0 : i32
    %c0_i32_1 = arith.constant 0 : i32
    return %arg0, %c0_i32, %c0_i32_0 : i32, i32, i32
  }
  func.func @transform_1(%arg0: i32) -> (i32, i32, i32) {
    %c0_i32 = arith.constant 0 : i32
    %c0_i32_0 = arith.constant 0 : i32
    %c0_i32_1 = arith.constant 0 : i32
    return %arg0, %c0_i32, %c0_i32_0 : i32, i32, i32
  }
}

</mosaic_0001>

<bundles_post_ra>
// kernel: tpu_custom_call.1
= control target key start
LH: loop header
LB: loop body
LE: loop exit
PB: predicated region body
PF: predicated region fallthrough
CT: control target
= control target key end

     0   :  { %vm16_vm0 = vcmask 1042432   ;;  %vm49_vm1 = vcmask 0   ;;  %s88_s0 = inlined_call_operand.vmem [shape: f32[2,3,256], index: 0, kind: input, shape index: {}]   ;;  %s89_s1 = inlined_call_operand.vmem [shape: f32[2,1,1], index: 1, kind: output, shape index: {}]  }
   0x1   :  { %v8_v0 = vld [vmem:[%s88_s0] sm:$0x77]  ;;  %v9_v1 = vld [vmem:[%s88_s0 + $0x8] sm:$0x77] }
   0x2   :  { %v12_v2 = vcombine.high %v8_v0, %v8_v0  ;;  %v17_v3 = vsel %vm16_vm0, %v8_v0, 0.0  ;;  %v13_v4 = vcombine.high %v9_v1, %v9_v1  ;;  %v22_v6 = vsel %vm16_vm0, %v9_v1, 0.0 }
   0x4   :  { %v18_v5 = vsel %vm16_vm0, %v12_v2, 0.0  ;;  %v23_v7 = vsel %vm16_vm0, %v13_v4, 0.0 }
   0x5   :  { %v19_v8 = vadd.f32 %v18_v5, %v17_v3  ;;  %v24_v9 = vadd.f32 %v23_v7, %v22_v6 }
   0x7   :  { %20 = vadd.xlane.f32.xlu0 %v19_v8 }
   0xb   :  { %25 = vadd.xlane.f32.xlu0 %v24_v9 }
  0x94   :  { %v21_v10 = vpop.xlane.xlu0 %20 }
  0x95   :  { %v27_v11 = vmul.f32 0.00390625, %v21_v10 }
  0x97   :  { %v56_v12 = vadd.f32 -0.5, %v27_v11 }
  0x98   :  { %v26_v13 = vpop.xlane.xlu0 %25 }
  0x99   :  { %v31_v14 = vand.u32 2147483647, %v56_v12  ;;  %v28_v15 = vmul.f32 0.00390625, %v26_v13 }
  0x9b   :  { %v33_v16 = vsel %vm16_vm0, %v31_v14, 0.0  ;;  %v57_v17 = vadd.f32 -0.5, %v28_v15 }
  0x9c   :  { %v34_v18 = vrot.slane %v33_v16, 4 }
  0x9d   :  { %v32_v19 = vand.u32 2147483647, %v57_v17 }
  0x9e   :  { %v35_v20 = vadd.f32 %v34_v18, %v33_v16 }
  0x9f   :  { %v40_v21 = vsel %vm16_vm0, %v32_v19, 0.0 }
  0xa0   :  { %v36_v22 = vrot.slane %v35_v20, 2  ;;  %v41_v23 = vrot.slane %v40_v21, 4 }
  0xa2   :  { %v37_v24 = vadd.f32 %v36_v22, %v35_v20  ;;  %v42_v25 = vadd.f32 %v41_v23, %v40_v21 }
  0xa4   :  { %v38_v26 = vrot.slane %v37_v24, 1  ;;  %v43_v27 = vrot.slane %v42_v25, 2 }
  0xa6   :  { %v39_v28 = vadd.f32 %v38_v26, %v37_v24  ;;  %v44_v29 = vadd.f32 %v43_v27, %v42_v25 }
  0xa8   :  { %v47_v30 = vmul.f32 %v39_v28, %v39_v28  ;;  %v45_v31 = vrot.slane %v44_v29, 1 }
  0xaa   :  { %50 = vst.msk [vmem:[%s89_s1] sm:$0x1] %vm49_vm1, %v47_v30  ;;  %v46_v32 = vadd.f32 %v45_v31, %v44_v29 }
  0xac   :  { %v48_v33 = vmul.f32 %v46_v32, %v46_v32 }
  0xae   :  { %51 = vst.msk [vmem:[%s89_s1 + $0x1] sm:$0x1] %vm49_vm1, %v48_v33 }

</bundles_post_ra>
